<compile_context>
chip_gen: v6e
topology: v6e:2x2x1
jax: 0.10.0
libtpu: 0.0.40
codegen_flags: <defaults>
</compile_context>

<pallas_src>
import jax
import jax.numpy as jnp
from jax.experimental import pallas as pl
from jax.experimental.pallas import tpu as pltpu


_COL_CANDIDATES = (1024, 512, 256, 128)      # widest 128-multiple lane dim that divides numel
_TARGET_BLOCK_BYTES = 2 * 1024 * 1024        # 2 MiB/buffer: fits v5e scoped VMEM & v7x 64 MiB VMEM


def _hsigmoid_math(x):
    # relu6(x + 3) / 6, computed in the input dtype (matches PyTorch semantics;
    # Python scalars are weak-typed in JAX so bf16 stays bf16).
    return jnp.clip(x + 3.0, 0.0, 6.0) * (1.0 / 6.0)


def _hsigmoid_kernel(x_ref, o_ref):
    o_ref[...] = _hsigmoid_math(x_ref[...]).astype(o_ref.dtype)


def _pick_tile_rows(rows, cols, itemsize):
    """Row-tile sized for ~2 MiB blocks; multiple of 32 (sublane-pack safe)."""
    tr = _TARGET_BLOCK_BYTES // (cols * itemsize)
    tr = max(32, (tr // 32) * 32)
    if rows <= tr:
        return rows  # single full-extent block (legal: equals the full array dim)
    return tr        # rows > tr -> grid has >=2 steps (lets v7x use both TensorCores)


def _hsigmoid_2d(x2d, tile_rows):
    rows, cols = x2d.shape
    grid = (pl.cdiv(rows, tile_rows),)  # ragged last block is masked by Pallas
    nbytes = rows * cols * x2d.dtype.itemsize
    return pl.pallas_call(
        _hsigmoid_kernel,
        out_shape=jax.ShapeDtypeStruct((rows, cols), x2d.dtype),
        grid_spec=pl.GridSpec(
            grid=grid,
            in_specs=[pl.BlockSpec((tile_rows, cols), lambda i: (i, 0))],
            out_specs=pl.BlockSpec((tile_rows, cols), lambda i: (i, 0)),
        ),
        compiler_params=pltpu.CompilerParams(
            dimension_semantics=("parallel",),
        ),
        input_output_aliases={0: 0},  # in-place-friendly; XLA copies if x is still live
        cost_estimate=pl.CostEstimate(
            flops=3 * rows * cols, transcendentals=0, bytes_accessed=2 * nbytes
        ),
    )(x2d)


def h_sigmoid(x, inplace=False):
    """Elementwise hard-sigmoid on an arbitrary-shaped array via Pallas."""
    # `inplace` has no functional meaning in JAX; input_output_aliases provides the hint.
    orig_shape = x.shape
    dtype = x.dtype
    n = x.size
    if n == 0:
        return x

    x_flat = x.reshape(-1)

    cols = next((c for c in _COL_CANDIDATES if n % c == 0), None)
    if cols is None:
        # Truly ragged size: kernel on the 128-divisible prefix, tiny jnp epilogue for the tail.
        head = (n // 128) * 128
        tail_out = _hsigmoid_math(x_flat[head:]).astype(dtype)
        if head == 0:
            return tail_out.reshape(orig_shape)
        head_out = h_sigmoid(x_flat[:head]).reshape(-1)
        return jnp.concatenate([head_out, tail_out]).reshape(orig_shape)

    rows = n // cols
    x2d = x_flat.reshape(rows, cols)  # contiguous flat array -> zero-copy reshape
    tile_rows = _pick_tile_rows(rows, cols, x2d.dtype.itemsize)
    out2d = _hsigmoid_2d(x2d, tile_rows)
    return out2d.reshape(orig_shape)


class HSigmoid:
    """JAX/Pallas equivalent of the PyTorch HSigmoid module (no params)."""

    def __init__(self, inplace=False, *args, **kwargs):
        self.inplace = inplace

    def __call__(self, x):
        return h_sigmoid(x, inplace=self.inplace)

    def extra_repr(self):
        return "inplace={}".format(self.inplace)


if __name__ == "__main__":
    key = jax.random.PRNGKey(0)
    # NCHW input, small shape
    x = jax.random.normal(key, (2, 4, 16, 16), dtype=jnp.float32) * 4.0

    mod = HSigmoid(inplace=False)
    out = mod(x)
    out = jax.block_until_ready(out)

    # reference check
    ref = jnp.clip(x + 3.0, 0.0, 6.0) / 6.0
    assert out.shape == x.shape and out.dtype == x.dtype
    assert jnp.max(jnp.abs(out - ref)) < 1e-6

    # also exercise a ragged size (hits the prefix + epilogue path)
    y = jax.random.normal(jax.random.PRNGKey(1), (1, 3, 7, 13), dtype=jnp.float32) * 4.0
    out_y = jax.block_until_ready(h_sigmoid(y))
    ref_y = jnp.clip(y + 3.0, 0.0, 6.0) / 6.0
    assert jnp.max(jnp.abs(out_y - ref_y)) < 1e-6

    print("KERNEL_OK")
</pallas_src>

<mosaic_0001>
module attributes {stable_mosaic.version = 11 : i64} {
  func.func @_hsigmoid_kernel(%arg0: i32, %arg1: memref<2x1024xf32, #tpu.memory_space<vmem>>, %arg2: memref<2x1024xf32, #tpu.memory_space<vmem>>) attributes {dimension_semantics = [#tpu.dimension_semantics<parallel>], iteration_bounds = array<i64: 1>, scalar_prefetch = 0 : i64, scratch_operands = 0 : i64, tpu.core_type = #tpu.core_type<tc>, window_params = [{transform_indices = @transform_0, window_bounds = array<i64: 2, 1024>}, {transform_indices = @transform_1, window_bounds = array<i64: 2, 1024>}]} {
    %c0 = arith.constant 0 : index
    %c0_0 = arith.constant 0 : index
    %0 = vector.load %arg1[%c0, %c0_0] : memref<2x1024xf32, #tpu.memory_space<vmem>>, vector<2x1024xf32>
    %cst = arith.constant 3.000000e+00 : f32
    %1 = vector.broadcast %cst : f32 to vector<2x1024xf32>
    %2 = arith.addf %0, %1 : vector<2x1024xf32>
    %cst_1 = arith.constant 0.000000e+00 : f32
    %cst_2 = arith.constant 6.000000e+00 : f32
    %3 = vector.broadcast %cst_1 : f32 to vector<2x1024xf32>
    %4 = arith.maximumf %3, %2 : vector<2x1024xf32>
    %5 = vector.broadcast %cst_2 : f32 to vector<2x1024xf32>
    %6 = arith.minimumf %5, %4 : vector<2x1024xf32>
    %cst_3 = arith.constant 0.166666672 : f32
    %7 = vector.broadcast %cst_3 : f32 to vector<2x1024xf32>
    %8 = arith.mulf %6, %7 : vector<2x1024xf32>
    %c0_4 = arith.constant 0 : index
    %c0_5 = arith.constant 0 : index
    %9 = vector.load %arg2[%c0_4, %c0_5] : memref<2x1024xf32, #tpu.memory_space<vmem>>, vector<2x1024xf32>
    tpu.vector_store %arg2[%c0_4, %c0_5], %8 {strides = array<i32>} : memref<2x1024xf32, #tpu.memory_space<vmem>>, vector<2x1024xf32>,
    return
  }
  func.func @transform_0(%arg0: i32) -> (i32, i32) {
    %c0_i32 = arith.constant 0 : i32
    %c0_i32_0 = arith.constant 0 : i32
    return %arg0, %c0_i32 : i32, i32
  }
  func.func @transform_1(%arg0: i32) -> (i32, i32) {
    %c0_i32 = arith.constant 0 : i32
    %c0_i32_0 = arith.constant 0 : i32
    return %arg0, %c0_i32 : i32, i32
  }
}

</mosaic_0001>

<bundles_post_ra>
// kernel: tpu_custom_call.1
= control target key start
LH: loop header
LB: loop body
LE: loop exit
PB: predicated region body
PF: predicated region fallthrough
CT: control target
= control target key end

     0   :  { %6 = vsyncpa [#allocation3], 0  ;;  %s112_s0 = inlined_call_operand.hbm [shape: f32[2,1024], index: 0, kind: input, shape index: {}, may-alias: {0,1}]   ;;  %s113_s1 = inlined_call_operand.hbm [shape: f32[2,1024], index: 1, kind: output, shape index: {}, may-alias: {0,1}]  }
   0x1   :  { %7 = vsyncpa [#allocation4], 0  ;;  %s94_s6 = smov [#allocation2]  }
   0x2   :  { %s14_s7 = sshll.u32 %s94_s6, 4  ;;  %s15_s7 = int_to_ptr.vmem [resolvable:$true] %s14_s7 }
   0x3   :  { %s58_s8 = scalar_lea.vmem %s15_s7, 256  ;;  %p63_p1 = scmp.lt.s32.totalorder %s15_s7, %s15_s7 }
   0x4   :  { %p59_p0 = scmp.ne.s32.totalorder %s15_s7, %s58_s8  ;;  %p64_p2 = scmp.lt.s32.totalorder %s58_s8, %s58_s8 }
   0x6   :  { %p65_p3 = por %p64_p2, %p63_p1 }
   0x8   :  { %p66_p4 = pnand %p65_p3, %p59_p0 }
   0xa   :  { %69 = shalt.err (!%p66_p4)
}
   0xb   :  { %17 = dma.hbm_to_vmem [thread:$0]  %s112_s0, 256, %s15_s7, [#allocation3]  }
   0xc   :  { %90 = dma.done.wait [#allocation3], 256  }
   0xd   :  { %91 = vsyncadd [#allocation3], 4294967040  ;;  %v21_v0 = vld [vmem:[#allocation2] sm:$0xff]  ;;  %v22_v1 = vld [vmem:[#allocation2 + $0x8] sm:$0xff]  ;;  %s95_s11 = smov [#allocation5]  }
   0xe   :  { %v23_v2 = vadd.f32 3.0, %v21_v0  ;;  %v24_v3 = vadd.f32 3.0, %v22_v1  ;;  %s39_s12 = sshll.u32 %s95_s11, 4  ;;  %s40_s12 = int_to_ptr.vmem [resolvable:$true] %s39_s12 }
   0xf   :  { %s70_s13 = scalar_lea.vmem %s40_s12, 256  ;;  %p75_p6 = scmp.lt.s32.totalorder %s40_s12, %s40_s12 }
  0x10   :  { %v25_v4 = vmax.f32 %v23_v2, 0.0  ;;  %v26_v5 = vmax.f32 %v24_v3, 0.0  ;;  %p71_p5 = scmp.ne.s32.totalorder %s40_s12, %s70_s13  ;;  %p76_p7 = scmp.lt.s32.totalorder %s70_s13, %s70_s13 }
  0x12   :  { %v27_v6 = vmin.f32 %v25_v4, 6.0  ;;  %v28_v7 = vmin.f32 %v26_v5, 6.0  ;;  %p77_p8 = por %p76_p7, %p75_p6 }
  0x14   :  { %v29_v8 = vmul.f32 0.16666667, %v27_v6  ;;  %v30_v9 = vmul.f32 0.16666667, %v28_v7  ;;  %p78_p9 = pnand %p77_p8, %p71_p5 }
  0x16   :  { %31 = vst [vmem:[#allocation5] sm:$0xff] %v29_v8  ;;  %32 = vst [vmem:[#allocation5 + $0x8] sm:$0xff] %v30_v9 }
  0x17   :  { %81 = shalt.err (!%p78_p9)
}
  0x18   :  { %42 = dma.vmem_to_hbm [thread:$0]  %s40_s12, 256, %s113_s1, [#allocation4]  }
  0x19   :  { %92 = dma.done.wait [#allocation4], 256  }
  0x1a   :  { %93 = vsyncadd [#allocation4], 4294967040 }
  0x1b   :  { %46 = vsyncpa [#allocation3], 1 }
  0x1c   :  { %47 = vsyncpa [#allocation4], 1 }

</bundles_post_ra>
